<compile_context>
chip_gen: v7x
topology: tpu7x:2x2x1
jax: 0.10.0
libtpu: 0.0.40
codegen_flags: <defaults>
</compile_context>

<pallas_src>
import functools
import numpy as np
import jax
import jax.numpy as jnp
from jax import lax
from jax.experimental import pallas as pl
from jax.experimental.pallas import tpu as pltpu


def _round_up(x, m):
    return ((x + m - 1) // m) * m


def _cdiv(a, b):
    return -(-a // b)


# ----------------------------------------------------------------------------
# Pallas kernel.
# grid = (head_group [parallel], 2 passes, tail_tiles, head_tiles_per_group)
#   pass 0: accumulate running max / softmax denom / masked prob-sum
#   pass 1: recompute the score tile, write exp(s - m) * per-row factor,
#           sparsify, clamp, train-mask overwrite.
# ----------------------------------------------------------------------------
def _kge_kernel(hr_ref, ent_ref, mask_ref, cnt_ref, out_ref,
                m_sc, d_sc, s_sc,
                *, n_entity, mask_cols, sparse, threshold, epsilon,
                train_mask, heads_per_group):
    g = pl.program_id(0)          # head group (megacore-parallel axis)
    p = pl.program_id(1)          # 0 = stats pass, 1 = output pass
    j = pl.program_id(2)          # tail tile index
    i = pl.program_id(3)          # head tile within the group
    tn = ent_ref.shape[0]
    head_blk = g * heads_per_group + i   # global head-tile id -> stats slot

    # Fused ComplEx score: (HB, D) x (TN, D)^T -> (HB, TN).  'nt' contraction
    # on the natural (N, D) entity layout -> no host-side transpose needed.
    scores = lax.dot_general(
        hr_ref[...], ent_ref[...],
        dimension_numbers=(((1,), (1,)), ((), ())),
        preferred_element_type=jnp.float32)

    if mask_cols:
        # Exclude lane/row padding beyond n_entity from the softmax.
        col = j * tn + lax.broadcasted_iota(jnp.int32, (1, tn), 1)
        scores = jnp.where(col < n_entity, scores, -jnp.inf)

    # Reset this head tile's statistics at the first tail tile of pass 0.
    @pl.when((p == 0) & (j == 0))
    def _():
        m_sc[head_blk] = jnp.full(m_sc.shape[1:], -jnp.inf, jnp.float32)
        d_sc[head_blk] = jnp.zeros(d_sc.shape[1:], jnp.float32)
        s_sc[head_blk] = jnp.zeros(s_sc.shape[1:], jnp.float32)

    @pl.when(p == 0)
    def _():
        mf = mask_ref[...].astype(jnp.float32)                    # (HB, TN)
        m_prev = m_sc[head_blk]
        m_new = jnp.maximum(m_prev, jnp.max(scores, axis=-1, keepdims=True))
        corr = jnp.exp(m_prev - m_new)
        e = jnp.exp(scores - m_new)
        d_sc[head_blk] = d_sc[head_blk] * corr + jnp.sum(e, axis=-1, keepdims=True)
        s_sc[head_blk] = s_sc[head_blk] * corr + jnp.sum(e * mf, axis=-1, keepdims=True)
        m_sc[head_blk] = m_new

    @pl.when(p == 1)
    def _():
        e = jnp.exp(scores - m_sc[head_blk])                      # (HB, TN)
        cnt = cnt_ref[...]                                        # (HB, 1)
        has_obs = cnt > 0.0
        # Per-row scalar factor folds softmax denom AND observed-tail rescale
        # into one multiply of the (HB, TN) tile (denominator cancels when an
        # observed-tail set exists).
        inv_d = pl.reciprocal(d_sc[head_blk], approx=False)
        inv_s = pl.reciprocal(jnp.where(has_obs, s_sc[head_blk], 1.0), approx=False)
        factor = jnp.where(has_obs, cnt * inv_s, inv_d)           # (HB, 1)
        scaled = e * factor
        if sparse:
            scaled = jnp.where(scaled > threshold, scaled, 0.0)
        upper = (1.0 - epsilon) if train_mask else 1.0
        res = jnp.clip(scaled, 0.0, upper)
        if train_mask:
            res = jnp.where(mask_ref[...] != 0, 1.0, res)
        out_ref[...] = res.astype(out_ref.dtype)


# ----------------------------------------------------------------------------
# Wrapper = Kge_finetune.forward(rel_id, head_ent_vec, train_mask)
# ----------------------------------------------------------------------------
def kge_finetune_forward(rel_id, head_ent_vec, ent_emb, rel_emb,
                         hr2t_mask_for_rel,
                         *, sparse, threshold, epsilon, train_mask,
                         head_block=256, n_block=1024, num_head_groups=2,
                         matmul_dtype=jnp.bfloat16, out_dtype=jnp.float32,
                         vmem_limit_bytes=None):
    ent_emb = jnp.asarray(ent_emb, jnp.float32)
    rel_emb = jnp.asarray(rel_emb, jnp.float32)
    n_entity, ent_dim = ent_emb.shape
    rank = ent_dim // 2

    # Host-side glue: data-dependent nonzero extraction (like torch.nonzero).
    nz = np.nonzero(np.asarray(head_ent_vec))[0].astype(np.int32)
    n_heads = int(nz.shape[0])
    if n_heads == 0:
        return jnp.zeros((0, n_entity), jnp.float32)

    # --- head tiling: adapt the tile to the real head count (sublane-8 is
    # enough for M; if several head tiles are needed, round to 32 so the
    # int8 mask tiles stay natively tileable). ---
    hb = min(int(head_block), _round_up(n_heads, 8))
    if _round_up(n_heads, 8) > hb:
        hb = _round_up(hb, 32)
    n_head_tiles = _cdiv(n_heads, hb)
    n_groups = max(1, min(int(num_head_groups), n_head_tiles))   # v7x: 2 TCs
    hpg = _cdiv(n_head_tiles, n_groups)
    n_head_tiles = n_groups * hpg
    h_pad = n_head_tiles * hb

    head_idx_np = np.zeros((h_pad,), np.int32)
    head_idx_np[:n_heads] = nz
    head_idx = jnp.asarray(head_idx_np)

    # --- tail (entity) tiling: lane-dense multiple of 128 ---
    tn = _round_up(min(int(n_block), _round_up(n_entity, 128)), 128)
    n_pad = _round_up(n_entity, tn)
    n_tail_tiles = n_pad // tn
    mask_cols = (n_pad != n_entity)

    # hr = head (*) rel in ComplEx form, computed ONCE in the wrapper (O(H*D)).
    head_embs = ent_emb[head_idx]                                 # (H_pad, D)
    r = rel_emb[rel_id]
    h_re, h_im = head_embs[:, :rank], head_embs[:, rank:]
    r_re, r_im = r[:rank], r[rank:]
    hr = jnp.concatenate([h_re * r_re - h_im * r_im,
                          h_re * r_im + h_im * r_re], axis=-1)
    hr = hr.astype(matmul_dtype)                                  # (H_pad, D)

    # Entity table stays in its natural (N, D) layout (no transpose); rows
    # padded to a multiple of the tail tile.
    ent_n = ent_emb.astype(matmul_dtype)
    if mask_cols:
        ent_n = jnp.pad(ent_n, ((0, n_pad - n_entity), (0, 0)))

    # Observed-tail mask (selected heads only, int8) + precomputed per-head
    # observed counts.
    obs_bool = (jnp.asarray(hr2t_mask_for_rel)[head_idx] != 0)
    obs_cnt = jnp.sum(obs_bool.astype(jnp.float32), axis=1, keepdims=True)
    obs_mask = obs_bool.astype(jnp.int8)
    if mask_cols:
        obs_mask = jnp.pad(obs_mask, ((0, 0), (0, n_pad - n_entity)))

    kernel = functools.partial(
        _kge_kernel,
        n_entity=int(n_entity), mask_cols=mask_cols,
        sparse=bool(sparse), threshold=float(threshold),
        epsilon=float(epsilon), train_mask=bool(train_mask),
        heads_per_group=hpg)

    # Index maps.  ent depends only on the tail index -> streamed 2x per core
    # total.  Output is pinned at the group's first block during pass 0 (no
    # junk writebacks; the first pass-1 step fully overwrites that buffer
    # before it is ever flushed).  The mask DMA is pinned during pass 1 when
    # train_mask=False (it is never read there).
    hr_map = lambda g, p, j, i: (g * hpg + i, 0)
    ent_map = lambda g, p, j, i: (j, 0)
    cnt_map = lambda g, p, j, i: (g * hpg + i, 0)
    out_map = lambda g, p, j, i: (g * hpg + i * p, j * p)
    if train_mask:
        mask_map = lambda g, p, j, i: (g * hpg + i, j)
    else:
        mask_map = lambda g, p, j, i: (g * hpg + i * (1 - p), j * (1 - p))

    grid = (n_groups, 2, n_tail_tiles, hpg)

    # Per-step VMEM at defaults (hb=256, tn=1024, bf16 operands):
    #   hr 64KB + ent 256KB + mask 256KB + out(f32) 1MB, double-buffered
    #   ~= 3.3 MB, plus ~3 MB of (hb,tn) f32 temporaries and the tiny
    #   (n_head_tiles, hb, 1) stats scratch -> well under the 16 MiB (v5e) /
    #   32 MiB (v6e/v7x) default scoped limits.  Raise vmem_limit_bytes for
    #   larger tiles.
    out = pl.pallas_call(
        kernel,
        out_shape=jax.ShapeDtypeStruct((h_pad, n_pad), out_dtype),
        grid_spec=pltpu.PrefetchScalarGridSpec(
            num_scalar_prefetch=0,
            grid=grid,
            in_specs=[
                pl.BlockSpec((hb, ent_dim), hr_map),    # hr tile (HB, D)
                pl.BlockSpec((tn, ent_dim), ent_map),   # entity tile (TN, D)
                pl.BlockSpec((hb, tn), mask_map),       # int8 observed mask
                pl.BlockSpec((hb, 1), cnt_map),         # per-head obs count
            ],
            out_specs=pl.BlockSpec((hb, tn), out_map),
            scratch_shapes=[pltpu.VMEM((n_head_tiles, hb, 1), jnp.float32)] * 3,
        ),
        compiler_params=pltpu.CompilerParams(
            dimension_semantics=("parallel", "arbitrary", "arbitrary", "arbitrary"),
            vmem_limit_bytes=vmem_limit_bytes),
    )(hr, ent_n, obs_mask, obs_cnt)

    return out[:n_heads, :n_entity].astype(jnp.float32)


# ----------------------------------------------------------------------------
# Pure numpy reference (mirrors the PyTorch forward, ComplEx score function)
# ----------------------------------------------------------------------------
def reference_forward(rel_id, head_ent_vec, ent_emb, rel_emb, hr2t_mask_for_rel,
                      *, sparse, threshold, epsilon, train_mask):
    ent_emb = np.asarray(ent_emb, np.float64)
    rel_emb = np.asarray(rel_emb, np.float64)
    mask_mat = np.asarray(hr2t_mask_for_rel, np.float64)
    n_entity = ent_emb.shape[0]
    rank = rel_emb.shape[1] // 2
    nz = np.nonzero(np.asarray(head_ent_vec))[0]
    if nz.shape[0] == 0:
        return np.zeros((0, n_entity), np.float64)

    rel = rel_emb[rel_id]
    r_re, r_im = rel[:rank], rel[rank:]
    t_re, t_im = ent_emb[:, :rank], ent_emb[:, rank:]

    rows = []
    for h in nz:
        h_re, h_im = ent_emb[h, :rank], ent_emb[h, rank:]
        score = (h_re * r_re - h_im * r_im) @ t_re.T + (h_re * r_im + h_im * r_re) @ t_im.T
        score = score - score.max()
        prob = np.exp(score) / np.exp(score).sum()
        m = mask_mat[h]
        obs_num = m.sum()
        scaling = obs_num / (prob * m).sum() if obs_num > 0 else 1.0
        scaled = prob * scaling
        if sparse:
            scaled = np.where(scaled > threshold, scaled, 0.0)
        upper = 1.0 - epsilon if train_mask else 1.0
        c = np.clip(scaled, 0.0, upper)
        if train_mask:
            c = np.where(m > 0, 1.0, c)
        rows.append(c)
    return np.stack(rows)


# ----------------------------------------------------------------------------
if __name__ == "__main__":
    # Deterministic synthetic setup (small shapes).  N_ENTITY is deliberately
    # NOT a multiple of 128 to exercise the lane/row-padding path, and the
    # head count is large enough to exercise multiple head tiles + the
    # 2-group (megacore) path.
    N_ENTITY = 250
    RANK = 64
    ENT_DIM = 2 * RANK      # 128
    N_REL = 4
    REL_ID = 1
    SPARSE = True
    THRESHOLD = 1e-3
    EPSILON = 0.1

    key = jax.random.PRNGKey(0)
    k_ent, k_rel, k_head = jax.random.split(key, 3)
    ent_emb = jax.random.normal(k_ent, (N_ENTITY, ENT_DIM), jnp.float32) * 0.5
    rel_emb = jax.random.normal(k_rel, (N_REL, ENT_DIM), jnp.float32) * 0.5

    # head_ent_vec: sparse indicator over entities (~50 nonzero heads)
    head_ent_vec = (jax.random.uniform(k_head, (N_ENTITY,)) < 0.2).astype(jnp.float32)

    # observed_kg.hr2t for rel_id == REL_ID, as a dense 0/1 mask (h -> tails)
    hr2t_mask = np.zeros((N_ENTITY, N_ENTITY), np.float32)
    for h in range(N_ENTITY):
        for j in range(h % 4):  # 0..3 observed tails per head (some have none)
            hr2t_mask[h, (h * 7 + REL_ID + 13 * j) % N_ENTITY] = 1.0

    ok = True
    configs = [
        # (matmul_dtype, head_block, n_block, train_mask, check)
        (jnp.float32,   32, 128, False, "tight"),   # 2 head tiles, 2 tail tiles
        (jnp.float32,   32, 128, True,  "tight"),
        (jnp.float32,  256, 512, True,  "tight"),   # single tile both axes
        (jnp.bfloat16,  32, 128, False, "loose"),   # production bf16 path
    ]
    for mdt, hbk, nbk, tm, check in configs:
        out = kge_finetune_forward(
            REL_ID, head_ent_vec, ent_emb, rel_emb, hr2t_mask,
            sparse=SPARSE, threshold=THRESHOLD, epsilon=EPSILON,
            train_mask=tm, head_block=hbk, n_block=nbk, matmul_dtype=mdt)
        out = np.asarray(jax.block_until_ready(out))
        ref = reference_forward(
            REL_ID, head_ent_vec, ent_emb, rel_emb, hr2t_mask,
            sparse=SPARSE, threshold=THRESHOLD, epsilon=EPSILON, train_mask=tm)
        if out.shape != ref.shape:
            ok = False
            print("SHAPE MISMATCH", mdt, hbk, nbk, tm, out.shape, ref.shape)
            continue
        err = float(np.abs(out - ref).max())
        if check == "tight":
            good = np.allclose(out, ref, rtol=1e-3, atol=1e-4)
        else:
            # bf16 operands: the observed-tail rescale amplifies low-precision
            # error; outputs are clamped to [0, 1] so a small absolute bound
            # is the right criterion.
            good = err <= 0.08
        if not good:
            ok = False
            print("MISMATCH", str(mdt), hbk, nbk, tm, "max_abs_err=", err)

    # TODO(synk): create_whole_matrix()'s final `.to_sparse()` (COO sparse
    # tensor) has no Pallas equivalent; dense probabilities are returned.
    if ok:
        print("KERNEL_OK")
</pallas_src>

<mosaic_0001>
module attributes {stable_mosaic.version = 11 : i64} {
  func.func @_kge_kernel(%arg0: i32, %arg1: i32, %arg2: i32, %arg3: i32, %arg4: memref<32x128xf32, #tpu.memory_space<vmem>>, %arg5: memref<128x128xf32, #tpu.memory_space<vmem>>, %arg6: memref<32x128xi8, #tpu.memory_space<vmem>>, %arg7: memref<32x1xf32, #tpu.memory_space<vmem>>, %arg8: memref<32x128xf32, #tpu.memory_space<vmem>>, %arg9: memref<2x32x1xf32, #tpu.memory_space<vmem>>, %arg10: memref<2x32x1xf32, #tpu.memory_space<vmem>>, %arg11: memref<2x32x1xf32, #tpu.memory_space<vmem>>) attributes {dimension_semantics = [#tpu.dimension_semantics<parallel>, #tpu.dimension_semantics<arbitrary>, #tpu.dimension_semantics<arbitrary>, #tpu.dimension_semantics<arbitrary>], iteration_bounds = array<i64: 2, 2, 2, 1>, scalar_prefetch = 0 : i64, scratch_operands = 3 : i64, tpu.core_type = #tpu.core_type<tc>, window_params = [{transform_indices = @transform_0, window_bounds = array<i64: 32, 128>}, {transform_indices = @transform_1, window_bounds = array<i64: 128, 128>}, {transform_indices = @transform_2, window_bounds = array<i64: 32, 128>}, {transform_indices = @transform_3, window_bounds = array<i64: 32, 1>}, {transform_indices = @transform_4, window_bounds = array<i64: 32, 128>}]} {
    %c1_i32 = arith.constant 1 : i32
    %0 = arith.muli %arg0, %c1_i32 : i32
    %1 = arith.addi %0, %arg3 : i32
    %c0 = arith.constant 0 : index
    %c0_0 = arith.constant 0 : index
    %2 = vector.load %arg4[%c0, %c0_0] : memref<32x128xf32, #tpu.memory_space<vmem>>, vector<32x128xf32>
    %c0_1 = arith.constant 0 : index
    %c0_2 = arith.constant 0 : index
    %3 = vector.load %arg5[%c0_1, %c0_2] : memref<128x128xf32, #tpu.memory_space<vmem>>, vector<128x128xf32>
    %cst = arith.constant dense<0.000000e+00> : vector<32x128xf32>
    %4 = tpu.matmul %2, %3, %cst {dimension_numbers = #tpu.dot_dimension_numbers<[1], [1], [0], [0], [0, 0, 1, 0], [], []>} : vector<32x128xf32>, vector<128x128xf32>, vector<32x128xf32> -> vector<32x128xf32>
    %c128_i32 = arith.constant 128 : i32
    %5 = arith.muli %arg2, %c128_i32 : i32
    %6 = tpu.iota {dimensions = array<i32: 1>} : vector<1x128xi32>
    %7 = vector.broadcast %5 : i32 to vector<1x128xi32>
    %8 = arith.addi %7, %6 : vector<1x128xi32>
    %c250_i32 = arith.constant 250 : i32
    %9 = vector.broadcast %c250_i32 : i32 to vector<1x128xi32>
    %10 = arith.cmpi slt, %8, %9 : vector<1x128xi32>
    %cst_3 = arith.constant 0xFF800000 : f32
    %11 = vector.shape_cast %10 : vector<1x128xi1> to vector<1x128xi1>
    %12 = vector.broadcast %11 : vector<1x128xi1> to vector<32x128xi1>
    %13 = vector.broadcast %cst_3 : f32 to vector<32x128xf32>
    %14 = arith.select %12, %4, %13 : vector<32x128xi1>, vector<32x128xf32>
    %c0_i32 = arith.constant 0 : i32
    %15 = arith.cmpi eq, %arg1, %c0_i32 : i32
    %c0_i32_4 = arith.constant 0 : i32
    %16 = arith.cmpi eq, %arg2, %c0_i32_4 : i32
    %17 = arith.andi %15, %16 : i1
    %18 = arith.extui %17 : i1 to i32
    %c0_i32_5 = arith.constant 0 : i32
    %19 = arith.cmpi ne, %18, %c0_i32_5 : i32
    scf.if %19 {
      %cst_10 = arith.constant 0xFF800000 : f32
      %26 = vector.broadcast %cst_10 : f32 to vector<32x1xf32>
      %27 = arith.index_cast %1 : i32 to index
      %c0_11 = arith.constant 0 : index
      %c0_12 = arith.constant 0 : index
      %28 = vector.load %arg9[%27, %c0_11, %c0_12] : memref<2x32x1xf32, #tpu.memory_space<vmem>>, vector<1x32x1xf32>
      %29 = vector.shape_cast %28 : vector<1x32x1xf32> to vector<32x1xf32>
      %30 = vector.shape_cast %26 : vector<32x1xf32> to vector<1x32x1xf32>
      tpu.vector_store %arg9[%27, %c0_11, %c0_12], %30 {strides = array<i32>} : memref<2x32x1xf32, #tpu.memory_space<vmem>>, vector<1x32x1xf32>,
      %cst_13 = arith.constant 0.000000e+00 : f32
      %31 = vector.broadcast %cst_13 : f32 to vector<32x1xf32>
      %32 = arith.index_cast %1 : i32 to index
      %c0_14 = arith.constant 0 : index
      %c0_15 = arith.constant 0 : index
      %33 = vector.load %arg10[%32, %c0_14, %c0_15] : memref<2x32x1xf32, #tpu.memory_space<vmem>>, vector<1x32x1xf32>
      %34 = vector.shape_cast %33 : vector<1x32x1xf32> to vector<32x1xf32>
      %35 = vector.shape_cast %31 : vector<32x1xf32> to vector<1x32x1xf32>
      tpu.vector_store %arg10[%32, %c0_14, %c0_15], %35 {strides = array<i32>} : memref<2x32x1xf32, #tpu.memory_space<vmem>>, vector<1x32x1xf32>,
      %cst_16 = arith.constant 0.000000e+00 : f32
      %36 = vector.broadcast %cst_16 : f32 to vector<32x1xf32>
      %37 = arith.index_cast %1 : i32 to index
      %c0_17 = arith.constant 0 : index
      %c0_18 = arith.constant 0 : index
      %38 = vector.load %arg11[%37, %c0_17, %c0_18] : memref<2x32x1xf32, #tpu.memory_space<vmem>>, vector<1x32x1xf32>
      %39 = vector.shape_cast %38 : vector<1x32x1xf32> to vector<32x1xf32>
      %40 = vector.shape_cast %36 : vector<32x1xf32> to vector<1x32x1xf32>
      tpu.vector_store %arg11[%37, %c0_17, %c0_18], %40 {strides = array<i32>} : memref<2x32x1xf32, #tpu.memory_space<vmem>>, vector<1x32x1xf32>,
    } else {
    }
    %c0_i32_6 = arith.constant 0 : i32
    %20 = arith.cmpi eq, %arg1, %c0_i32_6 : i32
    %21 = arith.extui %20 : i1 to i32
    %c0_i32_7 = arith.constant 0 : i32
    %22 = arith.cmpi ne, %21, %c0_i32_7 : i32
    scf.if %22 {
      %c0_10 = arith.constant 0 : index
      %c0_11 = arith.constant 0 : index
      %26 = vector.load %arg6[%c0_10, %c0_11] : memref<32x128xi8, #tpu.memory_space<vmem>>, vector<32x128xi8>
      %27 = arith.sitofp %26 : vector<32x128xi8> to vector<32x128xf32>
      %28 = arith.index_cast %1 : i32 to index
      %c0_12 = arith.constant 0 : index
      %c0_13 = arith.constant 0 : index
      %29 = vector.load %arg9[%28, %c0_12, %c0_13] : memref<2x32x1xf32, #tpu.memory_space<vmem>>, vector<1x32x1xf32>
      %30 = vector.shape_cast %29 : vector<1x32x1xf32> to vector<32x1xf32>
      %cst_14 = arith.constant dense<0xFF800000> : vector<32xf32>
      %31 = vector.multi_reduction <maximumf>, %14, %cst_14 [1] : vector<32x128xf32> to vector<32xf32>
      %32 = vector.shape_cast %31 : vector<32xf32> to vector<32x1xf32>
      %33 = arith.maximumf %30, %32 : vector<32x1xf32>
      %34 = arith.subf %30, %33 : vector<32x1xf32>
      %35 = math.exp %34 : vector<32x1xf32>
      %36 = vector.broadcast %33 : vector<32x1xf32> to vector<32x128xf32>
      %37 = arith.subf %14, %36 : vector<32x128xf32>
      %38 = math.exp %37 : vector<32x128xf32>
      %39 = arith.index_cast %1 : i32 to index
      %c0_15 = arith.constant 0 : index
      %c0_16 = arith.constant 0 : index
      %40 = vector.load %arg10[%39, %c0_15, %c0_16] : memref<2x32x1xf32, #tpu.memory_space<vmem>>, vector<1x32x1xf32>
      %41 = vector.shape_cast %40 : vector<1x32x1xf32> to vector<32x1xf32>
      %42 = arith.mulf %41, %35 : vector<32x1xf32>
      %cst_17 = arith.constant dense<0.000000e+00> : vector<32xf32>
      %43 = vector.multi_reduction <add>, %38, %cst_17 [1] : vector<32x128xf32> to vector<32xf32>
      %44 = vector.shape_cast %43 : vector<32xf32> to vector<32x1xf32>
      %45 = arith.addf %42, %44 : vector<32x1xf32>
      %46 = arith.index_cast %1 : i32 to index
      %c0_18 = arith.constant 0 : index
      %c0_19 = arith.constant 0 : index
      %47 = vector.load %arg10[%46, %c0_18, %c0_19] : memref<2x32x1xf32, #tpu.memory_space<vmem>>, vector<1x32x1xf32>
      %48 = vector.shape_cast %47 : vector<1x32x1xf32> to vector<32x1xf32>
      %49 = vector.shape_cast %45 : vector<32x1xf32> to vector<1x32x1xf32>
      tpu.vector_store %arg10[%46, %c0_18, %c0_19], %49 {strides = array<i32>} : memref<2x32x1xf32, #tpu.memory_space<vmem>>, vector<1x32x1xf32>,
      %50 = arith.index_cast %1 : i32 to index
      %c0_20 = arith.constant 0 : index
      %c0_21 = arith.constant 0 : index
      %51 = vector.load %arg11[%50, %c0_20, %c0_21] : memref<2x32x1xf32, #tpu.memory_space<vmem>>, vector<1x32x1xf32>
      %52 = vector.shape_cast %51 : vector<1x32x1xf32> to vector<32x1xf32>
      %53 = arith.mulf %52, %35 : vector<32x1xf32>
      %54 = arith.mulf %38, %27 : vector<32x128xf32>
      %cst_22 = arith.constant dense<0.000000e+00> : vector<32xf32>
      %55 = vector.multi_reduction <add>, %54, %cst_22 [1] : vector<32x128xf32> to vector<32xf32>
      %56 = vector.shape_cast %55 : vector<32xf32> to vector<32x1xf32>
      %57 = arith.addf %53, %56 : vector<32x1xf32>
      %58 = arith.index_cast %1 : i32 to index
      %c0_23 = arith.constant 0 : index
      %c0_24 = arith.constant 0 : index
      %59 = vector.load %arg11[%58, %c0_23, %c0_24] : memref<2x32x1xf32, #tpu.memory_space<vmem>>, vector<1x32x1xf32>
      %60 = vector.shape_cast %59 : vector<1x32x1xf32> to vector<32x1xf32>
      %61 = vector.shape_cast %57 : vector<32x1xf32> to vector<1x32x1xf32>
      tpu.vector_store %arg11[%58, %c0_23, %c0_24], %61 {strides = array<i32>} : memref<2x32x1xf32, #tpu.memory_space<vmem>>, vector<1x32x1xf32>,
      %62 = arith.index_cast %1 : i32 to index
      %c0_25 = arith.constant 0 : index
      %c0_26 = arith.constant 0 : index
      %63 = vector.load %arg9[%62, %c0_25, %c0_26] : memref<2x32x1xf32, #tpu.memory_space<vmem>>, vector<1x32x1xf32>
      %64 = vector.shape_cast %63 : vector<1x32x1xf32> to vector<32x1xf32>
      %65 = vector.shape_cast %33 : vector<32x1xf32> to vector<1x32x1xf32>
      tpu.vector_store %arg9[%62, %c0_25, %c0_26], %65 {strides = array<i32>} : memref<2x32x1xf32, #tpu.memory_space<vmem>>, vector<1x32x1xf32>,
    } else {
    }
    %c1_i32_8 = arith.constant 1 : i32
    %23 = arith.cmpi eq, %arg1, %c1_i32_8 : i32
    %24 = arith.extui %23 : i1 to i32
    %c0_i32_9 = arith.constant 0 : i32
    %25 = arith.cmpi ne, %24, %c0_i32_9 : i32
    scf.if %25 {
      %26 = arith.index_cast %1 : i32 to index
      %c0_10 = arith.constant 0 : index
      %c0_11 = arith.constant 0 : index
      %27 = vector.load %arg9[%26, %c0_10, %c0_11] : memref<2x32x1xf32, #tpu.memory_space<vmem>>, vector<1x32x1xf32>
      %28 = vector.shape_cast %27 : vector<1x32x1xf32> to vector<32x1xf32>
      %29 = vector.broadcast %28 : vector<32x1xf32> to vector<32x128xf32>
      %30 = arith.subf %14, %29 : vector<32x128xf32>
      %31 = math.exp %30 : vector<32x128xf32>
      %c0_12 = arith.constant 0 : index
      %c0_13 = arith.constant 0 : index
      %32 = vector.load %arg7[%c0_12, %c0_13] : memref<32x1xf32, #tpu.memory_space<vmem>>, vector<32x1xf32>
      %cst_14 = arith.constant 0.000000e+00 : f32
      %33 = vector.broadcast %cst_14 : f32 to vector<32x1xf32>
      %34 = arith.cmpf ogt, %32, %33 : vector<32x1xf32>
      %35 = arith.index_cast %1 : i32 to index
      %c0_15 = arith.constant 0 : index
      %c0_16 = arith.constant 0 : index
      %36 = vector.load %arg10[%35, %c0_15, %c0_16] : memref<2x32x1xf32, #tpu.memory_space<vmem>>, vector<1x32x1xf32>
      %37 = vector.shape_cast %36 : vector<1x32x1xf32> to vector<32x1xf32>
      %38 = tpu.reciprocal %37 : vector<32x1xf32> -> vector<32x1xf32>
      %39 = arith.index_cast %1 : i32 to index
      %c0_17 = arith.constant 0 : index
      %c0_18 = arith.constant 0 : index
      %40 = vector.load %arg11[%39, %c0_17, %c0_18] : memref<2x32x1xf32, #tpu.memory_space<vmem>>, vector<1x32x1xf32>
      %41 = vector.shape_cast %40 : vector<1x32x1xf32> to vector<32x1xf32>
      %cst_19 = arith.constant 1.000000e+00 : f32
      %42 = vector.broadcast %cst_19 : f32 to vector<32x1xf32>
      %43 = arith.select %34, %41, %42 : vector<32x1xi1>, vector<32x1xf32>
      %44 = tpu.reciprocal %43 : vector<32x1xf32> -> vector<32x1xf32>
      %45 = arith.mulf %32, %44 : vector<32x1xf32>
      %46 = arith.select %34, %45, %38 : vector<32x1xi1>, vector<32x1xf32>
      %47 = vector.broadcast %46 : vector<32x1xf32> to vector<32x128xf32>
      %48 = arith.mulf %31, %47 : vector<32x128xf32>
      %cst_20 = arith.constant 1.000000e-03 : f32
      %49 = vector.broadcast %cst_20 : f32 to vector<32x128xf32>
      %50 = arith.cmpf ogt, %48, %49 : vector<32x128xf32>
      %cst_21 = arith.constant 0.000000e+00 : f32
      %51 = vector.broadcast %cst_21 : f32 to vector<32x128xf32>
      %52 = arith.select %50, %48, %51 : vector<32x128xi1>, vector<32x128xf32>
      %cst_22 = arith.constant 0.000000e+00 : f32
      %cst_23 = arith.constant 1.000000e+00 : f32
      %53 = vector.broadcast %cst_22 : f32 to vector<32x128xf32>
      %54 = arith.maximumf %53, %52 : vector<32x128xf32>
      %55 = vector.broadcast %cst_23 : f32 to vector<32x128xf32>
      %56 = arith.minimumf %55, %54 : vector<32x128xf32>
      %c0_24 = arith.constant 0 : index
      %c0_25 = arith.constant 0 : index
      %57 = vector.load %arg8[%c0_24, %c0_25] : memref<32x128xf32, #tpu.memory_space<vmem>>, vector<32x128xf32>
      tpu.vector_store %arg8[%c0_24, %c0_25], %56 {strides = array<i32>} : memref<32x128xf32, #tpu.memory_space<vmem>>, vector<32x128xf32>,
    } else {
    }
    return
  }
  func.func @transform_0(%arg0: i32, %arg1: i32, %arg2: i32, %arg3: i32) -> (i32, i32) {
    %c1_i32 = arith.constant 1 : i32
    %0 = arith.muli %arg0, %c1_i32 : i32
    %1 = arith.addi %0, %arg3 : i32
    %c0_i32 = arith.constant 0 : i32
    %c0_i32_0 = arith.constant 0 : i32
    return %1, %c0_i32 : i32, i32
  }
  func.func @transform_1(%arg0: i32, %arg1: i32, %arg2: i32, %arg3: i32) -> (i32, i32) {
    %c0_i32 = arith.constant 0 : i32
    %c0_i32_0 = arith.constant 0 : i32
    return %arg2, %c0_i32 : i32, i32
  }
  func.func @transform_2(%arg0: i32, %arg1: i32, %arg2: i32, %arg3: i32) -> (i32, i32) {
    %c1_i32 = arith.constant 1 : i32
    %0 = arith.muli %arg0, %c1_i32 : i32
    %c1_i32_0 = arith.constant 1 : i32
    %1 = arith.subi %c1_i32_0, %arg1 : i32
    %2 = arith.muli %arg3, %1 : i32
    %3 = arith.addi %0, %2 : i32
    %c1_i32_1 = arith.constant 1 : i32
    %4 = arith.subi %c1_i32_1, %arg1 : i32
    %5 = arith.muli %arg2, %4 : i32
    %c0_i32 = arith.constant 0 : i32
    return %3, %5 : i32, i32
  }
  func.func @transform_3(%arg0: i32, %arg1: i32, %arg2: i32, %arg3: i32) -> (i32, i32) {
    %c1_i32 = arith.constant 1 : i32
    %0 = arith.muli %arg0, %c1_i32 : i32
    %1 = arith.addi %0, %arg3 : i32
    %c0_i32 = arith.constant 0 : i32
    %c0_i32_0 = arith.constant 0 : i32
    return %1, %c0_i32 : i32, i32
  }
  func.func @transform_4(%arg0: i32, %arg1: i32, %arg2: i32, %arg3: i32) -> (i32, i32) {
    %c1_i32 = arith.constant 1 : i32
    %0 = arith.muli %arg0, %c1_i32 : i32
    %1 = arith.muli %arg3, %arg1 : i32
    %2 = arith.addi %0, %1 : i32
    %3 = arith.muli %arg2, %arg1 : i32
    %c0_i32 = arith.constant 0 : i32
    return %2, %3 : i32, i32
  }
}

</mosaic_0001>

<bundles_post_ra>
// kernel: tpu_custom_call.1
= control target key start
LH: loop header
LB: loop body
LE: loop exit
PB: predicated region body
PF: predicated region fallthrough
CT: control target
= control target key end

     0   :  { %s2095_s0 = inlined_call_operand.vmem [shape: f32[64,128], index: 0, kind: input, shape index: {}]   ;;  %s2096_s1 = inlined_call_operand.hbm [shape: f32[256,128], index: 1, kind: input, shape index: {}]   ;;  %s2097_s2 = inlined_call_operand.hbm [shape: s8[64,256], index: 2, kind: input, shape index: {}]   ;;  %s2098_s3 = inlined_call_operand.vmem [shape: f32[64,1], index: 3, kind: input, shape index: {}]   ;;  %s2099_s4 = inlined_call_operand.hbm [shape: f32[64,256], index: 4, kind: output, shape index: {}]  }
   0x1   :  { %2114 = sst [smem:[#allocation23_spill]] %s2095_s0 }
   0x2   :  { %2115 = sst [smem:[#allocation24_spill]] %s2096_s1 }
   0x3   :  { %2116 = sst [smem:[#allocation25_spill]] %s2098_s3 }
   0x4   :  { %2117 = sst [smem:[#allocation26_spill]] %s2099_s4 }
   0x5   :  { %9 = vsyncpa [#allocation6], 0 }
   0x6   :  { %11 = vsyncpa [#allocation6 + $0x1], 0 }
   0x7   :  { %12 = vsyncpa [#allocation9], 0 }
   0x8   :  { %14 = vsyncpa [#allocation9 + $0x1], 0 }
   0x9   :  { %15 = vsyncpa [#allocation7], 0 }
   0xa   :  { %17 = vsyncpa [#allocation7 + $0x1], 0  ;;  %s1563_s15 = smov 0   ;;  %s1565_s16 = smov 0  }
   0xb   :  { %s1567_s17 = smov 0   ;;  %s1569_s18 = smov 0  }
   0xc   :  { %s1571_s19 = smov 0   ;;  %s1573_s20 = smov 0  }
   0xd   :  { %s1575_s21 = smov 0   ;;  %s1577_s22 = smov 0  }
   0xe   :  { %s1579_s23 = smov 0   ;;  %s1581_s24 = smov 0  }
   0xf   :  { %s1583_s25 = smov 0   ;;  %s1585_s26 = smov 0  }
  0x10   :  { %s1587_s27 = smov 0   ;;  %s1589_s28 = smov 0  }
  0x11   :  { %s1591_s29 = smov 0   ;;  %s1593_s30 = smov 0  }
  0x12 LB: > { %2118 = sst [smem:[#allocation14_spill]] %s1496_s23  ;;  %p91_p0 = scmp.ne.s32.totalorder %s1496_s23, %s1492_s22  ;;  %s1524_s30 = sphi %s1593_s30, %s23_s30   ;;  %s1520_s29 = sphi %s1591_s29, %s2176_s29   ;;  %s1516_s28 = sphi %s1589_s28, %s2164_s28   ;;  %s1512_s27 = sphi %s1587_s27, %s2163_s27   ;;  %s1508_s26 = sphi %s1585_s26, %s2175_s26   ;;  %s1504_s25 = sphi %s1583_s25, %s2162_s25   ;;  %s1500_s24 = sphi %s1581_s24, %s2161_s24   ;;  %s1496_s23 = sphi %s1579_s23, %s2160_s23   ;;  %s1492_s22 = sphi %s1577_s22, %s2174_s22   ;;  %s1488_s21 = sphi %s1575_s21, %s2173_s21   ;;  %s1484_s20 = sphi %s1573_s20, %s2172_s20   ;;  %s1480_s19 = sphi %s1571_s19, %s2171_s19   ;;  %s1476_s18 = sphi %s1569_s18, %s2170_s18   ;;  %s1472_s17 = sphi %s1567_s17, %s2169_s17   ;;  %s1468_s16 = sphi %s1565_s16, %s2168_s16   ;;  %s1464_s15 = sphi %s1563_s15, %s2166_s15  }
  0x13   : > { %2119 = sst [smem:[#allocation15_spill]] %s1500_s24  ;;  %p2102_p1 = scmp.eq.s32.totalorder %s1524_s30, 0 }
  0x14   : > { %2120 = sst [smem:[#allocation16_spill]] %s1504_s25  ;;  %p2101_p3 = scmp.lt.s32.totalorder %s1524_s30, 8 }
  0x15   : > { %2121 = sst [smem:[#allocation17_spill]] %s1512_s27  ;;  %p93_p4 = por %p2102_p1, %p91_p0 }
  0x16   : > { %2122 = sst [smem:[#allocation18_spill]] %s1516_s28  ;;  %s230_s6 = sand.u32 1, %s1496_s23  }
  0x17   : > { %s964_s7 = sshll.u32 %s230_s6, 7  ;;  %s990_s8 = sshll.u32 %s1512_s27, 11 }
  0x18   : > { %s2123_s1 = sld [smem:[#allocation24_spill]]  ;;  %s234_s12 = scalar_lea.vmem [#allocation5], %s964_s7 }
  0x19   : > { %s241_s13 = sshll.u32 %s234_s12, 4  ;;  %p1663_p5 = pnand %p2101_p3, %p93_p4  ;;  %s1659_s13 = int_to_ptr.vmem [resolvable:$true] %s241_s13 }
  0x1a   : > { %p970_p6 = scmp.ge.s32.totalorder %s1524_s30, 1  ;;  %s1668_s5 = scalar_lea.sflag [#allocation6], %s230_s6 }
  0x1b   : > { %p1300_p8 = pneg %p1663_p5 }
  0x1e   : > { %s1657_s11 = scalar_lea.hbm %s2123_s1, %s990_s8  ;;  %s1303_s10 = scalar_lea.hbm %s2123_s1, 4096 }
  0x1f   : > { %s1298_s8 = scalar_lea.hbm %s1657_s11, 2048  ;;  %p1304_p11 = scmp.lt.u32.totalorder %s1657_s11, %s2123_s1 }
  0x20   : > { %p1299_p7 = scmp.ne.s32.totalorder %s1657_s11, %s1298_s8  ;;  %p1305_p12 = scmp.lt.u32.totalorder %s1303_s10, %s1298_s8 }
  0x21   : > { %p1307_p0 = scmp.lt.u32.totalorder %s1298_s8, %s1657_s11 }
  0x22   : > { %p1301_p9 = pnand %p1300_p8, %p1299_p7  ;;  %p1306_p13 = por %p1305_p12, %p1304_p11 }
  0x24   : > { %p1302_p10 = pneg %p1301_p9  ;;  %p1308_p4 = por %p1307_p0, %p1306_p13 }
  0x26   : > { %p1309_p3 = pnand %p1308_p4, %p1302_p10 }
  0x28   : > { %1312 = shalt.err (!%p1309_p3)
}
  0x29   : > { %s1313_s6 = scalar_lea.vmem %s1659_s13, 2048  ;;  %s1526_s7 = smov [#allocation5]  }
  0x2a   : > { %p1314_p7 = scmp.ne.s32.totalorder %s1659_s13, %s1313_s6  ;;  %s1318_s9 = sshll.u32 %s1526_s7, 4  ;;  %s1319_s9 = int_to_ptr.vmem [resolvable:$false] %s1318_s9 }
  0x2b   : > { %s1320_s4 = scalar_lea.vmem %s1319_s9, 4096  ;;  %p1321_p2 = scmp.lt.s32.totalorder %s1659_s13, %s1319_s9 }
  0x2c   : > { %p1316_p9 = pnand %p1314_p7, %p1300_p8  ;;  %p1322_p11 = scmp.lt.s32.totalorder %s1320_s4, %s1313_s6 }
  0x2e   : > { %p1317_p1 = pneg %p1316_p9  ;;  %p1323_p12 = por %p1322_p11, %p1321_p2 }
  0x30   : > { %p1324_p13 = pnand %p1323_p12, %p1317_p1 }
  0x32   : > { %1327 = shalt.err (!%p1324_p13)
}
  0x33   : > { %s1527_s8 = smov 128   ;;  %s1528_s10 = smov 8  }
  0x34   : > { %1107 = dma.hbm_to_vmem [thread:$0]  (!%p1663_p5), %s1657_s11, 2048, %s1659_s13, %s1668_s5, %s1527_s8, %s1527_s8, %s1528_s10  }
  0x35   : > { %p284_p1 = scmp.lt.s32.totalorder %s1524_s30, 9  ;;  %s2103_s6 = sadd.s32 4294967295, %s1524_s30  }
  0x36   : > { %s41_s9 = sadd.s32 1, %s1512_s27  ;;  %s45_s4 = sadd.s32 1, %s1516_s28 }
  0x37   : > { %p1699_p2 = pnand %p970_p6, %p284_p1  ;;  %p43_p3 = scmp.ge.s32.totalorder %s41_s9, 2 }
  0x38   : > { %s49_s1 = sadd.s32 1, %s1520_s29  ;;  %p1710_p8 = scmp.eq.s32.totalorder %s2103_s6, 0 }
  0x39   : > { %s107_s11 = ssub.s32 1, %s1516_s28  ;;  %s2178_s9 = smov (%p43_p3, %s41_s9), 0 }
  0x3a   : > { %2127 = sst [smem:[#allocation19_spill]] %s2178_s9  ;;  %s2180_s4 = smov (!%p43_p3, %s45_s4), %s1516_s28 }
  0x3b   : > { %s81_s13 = ssub.s32 %s1512_s27, %s2178_s9  ;;  %p2128_p5 = scmp.ne.s32.totalorder %s1492_s22, %s1488_s21 }
  0x3c   : > { %p47_p10 = scmp.ge.s32.totalorder %s2180_s4, 2  ;;  %p82_p0 = scmp.eq.s32.totalorder %s81_s13, 0 }
  0x3d   : > { %p1725_p6 = por %p1710_p8, %p2128_p5  ;;  %s1730_s8 = smul.u32 %s1512_s27, %s107_s11 }
  0x3e   : > { %s120_s10 = sadd.s32 1, %s1484_s20  ;;  %s2182_s4 = smov (%p47_p10, %s2180_s4), 0 }
  0x3f   : > { %s2129_s14 = scalar_select %p1725_p6, 1, 0 }
  0x40   : > { %2130 = sst [smem:[#allocation20_spill]] %s2182_s4  ;;  %s2184_s1 = smov (!%p47_p10, %s49_s1), %s1520_s29 }
  0x41   : > { %s2131_s21 = sadd.s32 1, %s1496_s23  ;;  %p51_p4 = scmp.ge.s32.totalorder %s2184_s1, 2 }
  0x42   : > { %s1739_s7 = scalar_select %p82_p0, %s1496_s23, %s2131_s21  }
  0x43   : > { %s111_s13 = ssub.s32 1, %s2182_s4  ;;  %p127_p7 = scmp.ne.s32.totalorder %s1484_s20, %s1480_s19 }
  0x44   : > { %2132 = sst [smem:[#allocation21_spill]] %s1739_s7  ;;  %s114_s11 = smul.u32 %s111_s13, %s2178_s9 }
  0x45   : > { %s2186_s1 = smov (%p51_p4, %s2184_s1), 0  ;;  %p2134_p9 = scmp.eq.s32.totalorder %s1524_s30, 0 }
  0x46   : > { %2133 = sst [smem:[#allocation22_spill]] %s2186_s1  ;;  %s116_s6 = ssub.s32 %s1730_s8, %s114_s11 }
  0x47   : > { %p1750_p11 = por %p127_p7, %p2134_p9  ;;  %s115_s21 = ssub.s32 %s1520_s29, %s2186_s1 }
  0x48   : > { %p133_p12 = scmp.ne.s32.totalorder %s1480_s19, %s1476_s18  ;;  %s117_s7 = sor.u32 %s116_s6, %s115_s21 }
  0x49   : > { %s173_s23 = smul.u32 %s1512_s27, %s1516_s28  ;;  %p118_p13 = scmp.eq.s32.totalorder %s117_s7, 0 }
  0x4a   : > { %p1762_p1 = por %p133_p12, %p1710_p8  ;;  %s176_s11 = smul.u32 %s2182_s4, %s2178_s9 }
  0x4b   : > { %s182_s25 = sadd.s32 1, %s1472_s17  ;;  %p192_p3 = scmp.ne.s32.totalorder %s1472_s17, %s1468_s16 }
  0x4c   : > { %s2136_s13 = scalar_select %p1762_p1, 1, 0 }
  0x4d   : > { %s1770_s0 = scalar_select %p118_p13, %s1484_s20, %s120_s10  }
  0x4e   : > { %s178_s3 = ssub.s32 %s173_s23, %s176_s11  ;;  %s2137_s18 = sadd.s32 4294967295, %s1524_s30  }
  0x4f   : > { %s179_s1 = sor.u32 %s178_s3, %s115_s21  ;;  %p193_p5 = scmp.eq.s32.totalorder %s2137_s18, 7 }
  0x50   : > { %p180_p10 = scmp.eq.s32.totalorder %s179_s1, 0  ;;  %p198_p0 = scmp.ne.s32.totalorder %s1468_s16, %s1464_s15 }
  0x51   : > { %p1778_p4 = por %p193_p5, %p192_p3  ;;  %s2139_s7 = sadd.s32 4294967294, %s1524_s30  }
  0x52   : > { %p199_p8 = scmp.eq.s32.totalorder %s2139_s7, 7  ;;  %s251_s23 = sand.u32 1, %s1484_s20  }
  0x53   : > { %s2138_s6 = scalar_select %p1778_p4, 1, 0 }
  0x54   : > { %s1785_s5 = scalar_select %p180_p10, %s1472_s17, %s182_s25  }
  0x55   : > { %p1787_p7 = por %p199_p8, %p198_p0  ;;  %s967_s3 = sshll.u32 %s251_s23, 3 }
  0x56   : > { %s968_s21 = sshll.u32 %s1520_s29, 1  ;;  %s255_s18 = scalar_lea.vmem [#allocation8], %s967_s3 }
  0x57   : > { %s2140_s10 = scalar_select %p1787_p7, 1, 0 }
  0x58   : > { %s264_s11 = sadd.s32 %s968_s21, %s1730_s8  ;;  %s268_s4 = sshll.u32 %s255_s18, 4  ;;  %s1794_s4 = int_to_ptr.vmem [resolvable:$true] %s268_s4 }
  0x59   : > { %s969_s1 = sshll.u32 %s264_s11, 7  ;;  %p2141_p9 = scmp.lt.s32.totalorder %s1524_s30, 8 }
  0x5a   : > { %s1799_s27 = scalar_lea.hbm %s2097_s2, %s969_s1  ;;  %s252_s8 = scalar_lea.sflag [#allocation9], %s251_s23 }
  0x5b   : > { %p1805_p12 = pnand %p2141_p9, %p1750_p11  ;;  %s1328_s7 = scalar_lea.hbm %s1799_s27, 128 }
  0x5c   : > { %p1329_p13 = scmp.ne.s32.totalorder %s1799_s27, %s1328_s7  ;;  %s1333_s9 = scalar_lea.hbm %s2097_s2, 512 }
  0x5d   : > { %p1330_p3 = pneg %p1805_p12  ;;  %p1334_p11 = scmp.lt.u32.totalorder %s1799_s27, %s2097_s2 }
  0x5e   : > { %p1335_p0 = scmp.lt.u32.totalorder %s1333_s9, %s1328_s7  ;;  %p1337_p9 = scmp.lt.u32.totalorder %s1328_s7, %s1799_s27 }
  0x5f   : > { %p1331_p5 = pnand %p1330_p3, %p1329_p13 }
  0x60   : > { %p1336_p8 = por %p1335_p0, %p1334_p11 }
  0x61   : > { %p1332_p10 = pneg %p1331_p5 }
  0x62   : > { %p1338_p7 = por %p1337_p9, %p1336_p8 }
  0x64   : > { %p1339_p4 = pnand %p1338_p7, %p1332_p10 }
  0x66   : > { %1342 = shalt.err (!%p1339_p4)
}
  0x67   : > { %s1343_s23 = scalar_lea.vmem %s1794_s4, 128  ;;  %s1529_s11 = smov [#allocation8]  }
  0x68   : > { %p1344_p13 = scmp.ne.s32.totalorder %s1794_s4, %s1343_s23  ;;  %s1348_s18 = sshll.u32 %s1529_s11, 4  ;;  %s1349_s18 = int_to_ptr.vmem [resolvable:$false] %s1348_s18 }
  0x69   : > { %s1350_s1 = scalar_lea.vmem %s1349_s18, 256  ;;  %p1351_p6 = scmp.lt.s32.totalorder %s1794_s4, %s1349_s18 }
  0x6a   : > { %p1346_p5 = pnand %p1344_p13, %p1330_p3  ;;  %p1352_p11 = scmp.lt.s32.totalorder %s1350_s1, %s1343_s23 }
  0x6c   : > { %p1347_p1 = pneg %p1346_p5  ;;  %p1353_p0 = por %p1352_p11, %p1351_p6 }
  0x6e   : > { %p1354_p8 = pnand %p1353_p0, %p1347_p1 }
  0x70   : > { %1357 = shalt.err (!%p1354_p8)
}
  0x71   : > { %1110 = dma.hbm_to_vmem [thread:$0]  (!%p1805_p12), %s1799_s27, 128, %s1794_s4, %s252_s8  }
  0x72   : > { %288 = sbr.rel (%p1699_p2) target bundleno = 1072 (0x430), region = 36  ;;  %s290_s7 = sand.u32 (!%p1699_p2), 1, %s1492_s22  }
  0x73   : > { %s971_s24 = sshll.u32 (!%p1699_p2), %s290_s7, 7  ;;  %s291_s28 = scalar_lea.sflag (!%p1699_p2), [#allocation6], %s290_s7 }
  0x74   : > { %s1837_s9 = scalar_lea.vmem (!%p1699_p2), [#allocation5], %s971_s24  ;;  %p2143_p4 = scmp.ne.s32.totalorder (!%p1699_p2), %s2129_s14, 0 }
  0x79   : > { %1451 = dma.done.wait (%p2143_p4), %s291_s28, 2048  }
  0x7a   : > { %1453 = vsyncadd (%p2143_p4), %s291_s28, 4294965248  ;;  %s299_s25 = sand.u32 1, %s1480_s19   ;;  %p2144_p2 = scmp.ne.s32.totalorder %s2136_s13, 0 }
  0x7b   : > { %s1844_s3 = sshll.u32 %s299_s25, 3  ;;  %s300_s27 = scalar_lea.sflag [#allocation9], %s299_s25 }
  0x7c   : > { %s303_s12 = scalar_lea.vmem [#allocation8], %s1844_s3 }
  0x7d   : > { %1455 = dma.done.wait (%p2144_p2), %s300_s27, 128  }
  0x7e   : > { %1457 = vsyncadd (%p2144_p2), %s300_s27, 4294967168  ;;  %s342_s4 = sand.u32 1, %s1468_s16   ;;  %s974_s14 = sshll.u32 %s1508_s26, 2  ;;  %v375_v0 = vld [vmem:[%s1837_s9] sm:$0xff]  ;;  %v376_v1 = vld [vmem:[%s1837_s9 + $0x8] sm:$0xff]  ;;  %v477_v28 = vlaneseq }
  0x7f   : > { %s1855_s8 = sshll.u32 %s342_s4, 5  ;;  %p347_p6 = scmp.lt.s32.totalorder %s974_s14, 7  ;;  %v377_v2 = vld [vmem:[%s1837_s9 + $0x10] sm:$0xff]  ;;  %v1050_v3 = vpack.c.bf16 %v376_v1, %v375_v0  ;;  %v378_v4 = vld [vmem:[%s1837_s9 + $0x18] sm:$0xff]  ;;  %v379_v8 = vld [vmem:[%s1837_s9 + $0x20] sm:$0xff] }
  0x80   : > { %s2145_s18 = sld [smem:[#allocation25_spill]]  ;;  %v1054_v5 = vpack.c.bf16 %v378_v4, %v377_v2  ;;  %s2146_s24 = sld [smem:[#allocation23_spill]]  ;;  %v380_v9 = vld [vmem:[%s1837_s9 + $0x28] sm:$0xff]  ;;  %v381_v11 = vld [vmem:[%s1837_s9 + $0x30] sm:$0xff]  ;;  %v382_v12 = vld [vmem:[%s1837_s9 + $0x38] sm:$0xff]  ;;  %v478_v29 = vand.u32 127, %v477_v28 }
  0x81   : > { %s2188_s14 = smov (!%p347_p6, %s974_s14), 7  ;;  %1051 = vmatprep.subr.bf16.mxu0 %v1050_v3  ;;  %1082 = vmatprep.subr.bf16.mxu1 %v1050_v3  ;;  %v1058_v10 = vpack.c.bf16 %v380_v9, %v379_v8  ;;  %v1062_v13 = vpack.c.bf16 %v382_v12, %v381_v11  ;;  %v383_v14 = vld [vmem:[%s1837_s9 + $0x40] sm:$0xff]  ;;  %v384_v15 = vld [vmem:[%s1837_s9 + $0x48] sm:$0xff]  ;;  %v385_v17 = vld [vmem:[%s1837_s9 + $0x50] sm:$0xff]  ;;  %s2147_s25 = sld [smem:[#allocation16_spill]] }
  0x82   : > { %s975_s21 = sshll.u32 %s2188_s14, 3  ;;  %1053 = vmatpush3.bf16.xpose.msra.mxu0 %v1050_v3  ;;  %1090 = vmatpush3.bf16.xpose.msra.mxu1 %v1050_v3  ;;  %v1066_v16 = vpack.c.bf16 %v384_v15, %v383_v14  ;;  %v386_v18 = vld [vmem:[%s1837_s9 + $0x58] sm:$0xff]  ;;  %v387_v20 = vld [vmem:[%s1837_s9 + $0x60] sm:$0xff]  ;;  %v388_v21 = vld [vmem:[%s1837_s9 + $0x68] sm:$0xff]  ;;  %s2148_s27 = sld [smem:[#allocation15_spill]] }
  0x83   : > { %1055 = vmatprep.subr.bf16.mxu0 %v1054_v5  ;;  %1083 = vmatprep.subr.bf16.mxu1 %v1054_v5  ;;  %v1070_v19 = vpack.c.bf16 %v386_v18, %v385_v17  ;;  %v1074_v22 = vpack.c.bf16 %v388_v21, %v387_v20  ;;  %v389_v23 = vld [vmem:[%s1837_s9 + $0x70] sm:$0xff]  ;;  %v390_v24 = vld [vmem:[%s1837_s9 + $0x78] sm:$0xff] }
  0x84   : > { %v1078_v25 = vpack.c.bf16 %v390_v24, %v389_v23 }
  0x86   : > { %s1860_s13 = scalar_lea.vmem %s2145_s18, %s975_s21  ;;  %s1869_s28 = scalar_lea.vmem %s2146_s24, %s975_s21 }
  0x87   : > { %v371_v6 = vld [vmem:[%s1869_s28] sm:$0xff]  ;;  %v373_v7 = vld [vmem:[%s1869_s28 + $0x10] sm:$0xff]  ;;  %v372_v26 = vld [vmem:[%s1869_s28 + $0x8] sm:$0xff]  ;;  %p488_p1 = scmp.eq.s32.totalorder %s2147_s25, 0  ;;  %s1903_s21 = scalar_lea.vmem [#allocation10], %s1855_s8 }
  0x88   : > { %1044 = vmatprep.mubr.f32.mxu0 %v371_v6  ;;  %1047 = vmatprep.mubr.f32.mxu1 %v373_v7  ;;  %v374_v27 = vld [vmem:[%s1869_s28 + $0x18] sm:$0xff]  ;;  %p489_p7 = scmp.eq.s32.totalorder %s2148_s27, 0  ;;  %s978_s9 = sshll.u32 %s2148_s27, 7 }
  0x89   : > { %v479_v30 = vstv %s978_s9 }
  0x8a   : > { %1057 = vmatpush3.bf16.xpose.msra.mxu0 %v1054_v5  ;;  %1091 = vmatpush3.bf16.xpose.msra.mxu1 %v1054_v5  ;;  %p1889_p12 = pnand %p489_p7, %p488_p1  ;;  %v480_v31 = vadd.s32 %v479_v30, %v478_v29 }
  0x8b   : > { %1059 = vmatprep.subr.bf16.mxu0 %v1058_v10  ;;  %1084 = vmatprep.subr.bf16.mxu1 %v1058_v10  ;;  %s979_s23 = sshll.u32 (!%p1889_p12), %s1508_s26, 5  ;;  %vm496_vm1 = vcmask (!%p1889_p12), 7168   ;;  %v1530_v40 = vmov (!%p1889_p12), -inf   ;;  %v1531_v41 = vmov (!%p1889_p12), 0.0  }
  0x8c   : > { %vm481_vm0 = vcmp.lt.s32.totalorder %v480_v31, 250  ;;  %s495_s11 = scalar_lea.vmem (!%p1889_p12), [#allocation2], %s979_s23  ;;  %s501_s18 = scalar_lea.vmem (!%p1889_p12), [#allocation3], %s979_s23 }
  0x8d   : > { %497 = vst.msk [vmem:[%s495_s11] sm:$0xff] (!%p1889_p12), %vm496_vm1, %v1530_v40  ;;  %498 = vst.msk [vmem:[%s495_s11 + $0x8] sm:$0xff] (!%p1889_p12), %vm496_vm1, %v1530_v40  ;;  %s506_s8 = scalar_lea.vmem (!%p1889_p12), [#allocation4], %s979_s23 }
  0x8e   : > { %499 = vst.msk [vmem:[%s495_s11 + $0x10] sm:$0xff] (!%p1889_p12), %vm496_vm1, %v1530_v40  ;;  %500 = vst.msk [vmem:[%s495_s11 + $0x18] sm:$0xff] (!%p1889_p12), %vm496_vm1, %v1530_v40 }
  0x8f   : > { %502 = vst.msk [vmem:[%s501_s18] sm:$0xff] (!%p1889_p12), %vm496_vm1, %v1531_v41  ;;  %503 = vst.msk [vmem:[%s501_s18 + $0x8] sm:$0xff] (!%p1889_p12), %vm496_vm1, %v1531_v41 }
  0x90   : > { %504 = vst.msk [vmem:[%s501_s18 + $0x10] sm:$0xff] (!%p1889_p12), %vm496_vm1, %v1531_v41  ;;  %505 = vst.msk [vmem:[%s501_s18 + $0x18] sm:$0xff] (!%p1889_p12), %vm496_vm1, %v1531_v41 }
  0x91   : > { %507 = vst.msk [vmem:[%s506_s8] sm:$0xff] (!%p1889_p12), %vm496_vm1, %v1531_v41  ;;  %508 = vst.msk [vmem:[%s506_s8 + $0x8] sm:$0xff] (!%p1889_p12), %vm496_vm1, %v1531_v41 }
  0x92   : > { %1061 = vmatpush3.bf16.xpose.msra.mxu0 %v1058_v10  ;;  %1092 = vmatpush3.bf16.xpose.msra.mxu1 %v1058_v10  ;;  %509 = vst.msk [vmem:[%s506_s8 + $0x10] sm:$0xff] (!%p1889_p12), %vm496_vm1, %v1531_v41  ;;  %510 = vst.msk [vmem:[%s506_s8 + $0x18] sm:$0xff] (!%p1889_p12), %vm496_vm1, %v1531_v41 }
  0x93   : > { %1063 = vmatprep.subr.bf16.mxu0 %v1062_v13  ;;  %1085 = vmatprep.subr.bf16.mxu1 %v1062_v13 }
  0x9a   : > { %1065 = vmatpush3.bf16.xpose.msra.mxu0 %v1062_v13  ;;  %1093 = vmatpush3.bf16.xpose.msra.mxu1 %v1062_v13 }
  0x9b   : > { %1067 = vmatprep.subr.bf16.mxu0 %v1066_v16  ;;  %1086 = vmatprep.subr.bf16.mxu1 %v1066_v16 }
  0xa2   : > { %1069 = vmatpush3.bf16.xpose.msra.mxu0 %v1066_v16  ;;  %1094 = vmatpush3.bf16.xpose.msra.mxu1 %v1066_v16 }
  0xa3   : > { %1071 = vmatprep.subr.bf16.mxu0 %v1070_v19  ;;  %1087 = vmatprep.subr.bf16.mxu1 %v1070_v19 }
  0xaa   : > { %1073 = vmatpush3.bf16.xpose.msra.mxu0 %v1070_v19  ;;  %1095 = vmatpush3.bf16.xpose.msra.mxu1 %v1070_v19 }
  0xab   : > { %1075 = vmatprep.subr.bf16.mxu0 %v1074_v22  ;;  %1088 = vmatprep.subr.bf16.mxu1 %v1074_v22 }
  0xb2   : > { %1077 = vmatpush3.bf16.xpose.msra.mxu0 %v1074_v22  ;;  %1096 = vmatpush3.bf16.xpose.msra.mxu1 %v1074_v22 }
  0xb3   : > { %1079 = vmatprep.subr.bf16.mxu0 %v1078_v25  ;;  %1089 = vmatprep.subr.bf16.mxu1 %v1078_v25 }
  0xba   : > { %1081 = vmatpush3.bf16.xpose.msra.mxu0 %v1078_v25  ;;  %1097 = vmatpush3.bf16.xpose.msra.mxu1 %v1078_v25 }
  0xc1   : > { %1045 = vmatmul.mubr.f32.vlgmr.msra.gmra.mrb[0].mxu0 %v372_v26  ;;  %1048 = vmatmul.mubr.f32.vlgmr.msra.gmra.mrb[0].mxu1 %v374_v27 }
 0x190   : > { %493 = sbr.rel (%p1889_p12) target bundleno = 407 (0x197), region = 48 }
 0x194   : > { %v1046_v32 = vpop.f32.mrb[0].mxu0  ;;  %v1049_v33 = vpop.f32.mrb[0].mxu1 }
 0x195   : > { %v1894_v34 = vsel %vm481_vm0, %v1046_v32, -inf  ;;  %v1896_v35 = vsel %vm481_vm0, %v1049_v33, -inf  ;;  %v457_v36 = vpop.f32.mrb[1].mxu0  ;;  %v467_v37 = vpop.f32.mrb[1].mxu1 }
 0x196   : > { %v1898_v38 = vsel %vm481_vm0, %v457_v36, -inf  ;;  %v1900_v39 = vsel %vm481_vm0, %v467_v37, -inf }
 0x197 PF: > { %s2150_s1 = sld [smem:[#allocation16_spill]] }
 0x19d   : > { %p980_p3 = scmp.ne.s32.totalorder %s2150_s1, 0 }
 0x19e   : > { %529 = vmax.xlane.f32.xlu0 (!%p980_p3), %v1898_v38  ;;  %533 = vmax.xlane.f32.xlu1 (!%p980_p3), %v1900_v39  ;;  %v1532_v42 = vmov (!%p980_p3), 0   ;;  %s1926_s7 = sshll.u32 (!%p980_p3), %s1508_s26, 5  ;;  %vm606_vm2 = vcmask (!%p980_p3), 7168   ;;  %v514_v32 = vld [vmem:[%s303_s12] sm:$0xff] (!%p980_p3) }
 0x19f   : > { %513 = sbr.rel (%p980_p3) target bundleno = 870 (0x366), region = 52  ;;  %1254 = vset.pattern.permute.xlu0 (!%p980_p3), %v1532_v42  ;;  %1255 = vset.pattern.permute.xlu1 (!%p980_p3), %v1532_v42  ;;  %s524_s24 = scalar_lea.vmem (!%p980_p3), [#allocation2], %s1926_s7  ;;  %v517_v33 = vunpack.c.2.s8 (!%p980_p3), %v514_v32  ;;  %v515_v40 = vunpack.c.0.s8 (!%p980_p3), %v514_v32 }
 0x1a0   : > { %v525_v43 = vld [vmem:[%s524_s24] sm:$0xff] (!%p980_p3)  ;;  %v527_v44 = vld [vmem:[%s524_s24 + $0x10] sm:$0xff] (!%p980_p3)  ;;  %v526_v49 = vld [vmem:[%s524_s24 + $0x8] sm:$0xff] (!%p980_p3)  ;;  %s1934_s28 = scalar_lea.vmem (!%p980_p3), [#allocation3], %s1926_s7  ;;  %s1938_s25 = scalar_lea.vmem (!%p980_p3), [#allocation4], %s1926_s7 }
 0x1a1   : > { %v528_v50 = vld [vmem:[%s524_s24 + $0x18] sm:$0xff] (!%p980_p3)  ;;  %v586_v63 = vld [vmem:[%s1934_s28] sm:$0xff] (!%p980_p3)  ;;  %v588_v1 = vld [vmem:[%s1934_s28 + $0x10] sm:$0xff] (!%p980_p3)  ;;  %v521_v37 = vcvt.s32.f32 (!%p980_p3), %v517_v33 }
 0x1a2   : > { %531 = vmax.xlane.f32.xlu0 (!%p980_p3), %v1894_v34  ;;  %535 = vmax.xlane.f32.xlu1 (!%p980_p3), %v1896_v35  ;;  %v612_v0 = vld [vmem:[%s1938_s25] sm:$0xff] (!%p980_p3)  ;;  %v614_v2 = vld [vmem:[%s1938_s25 + $0x10] sm:$0xff] (!%p980_p3)  ;;  %v587_v7 = vld [vmem:[%s1934_s28 + $0x8] sm:$0xff] (!%p980_p3) }
 0x1a3   : > { %v613_v10 = vld [vmem:[%s1938_s25 + $0x8] sm:$0xff] (!%p980_p3)  ;;  %v589_v11 = vld [vmem:[%s1934_s28 + $0x18] sm:$0xff] (!%p980_p3) }
 0x1a4   : > { %v615_v12 = vld [vmem:[%s1938_s25 + $0x18] sm:$0xff] (!%p980_p3) }
 0x22b   : > { %v530_v45 = vpop.xlane.xlu0 %529  ;;  %v534_v46 = vpop.xlane.xlu1 %533 }
 0x22c   : > { %v537_v47 = vmax.f32 %v525_v43, %v530_v45  ;;  %v539_v48 = vmax.f32 %v527_v44, %v534_v46 }
 0x22e   : > { %v541_v51 = vsub.f32 %v525_v43, %v537_v47  ;;  %640 = vst.msk [vmem:[%s524_s24] sm:$0xff] %vm606_vm2, %v537_v47  ;;  %555 = vperm.xlu0 %1254, %v537_v47   ;;  %v543_v52 = vsub.f32 %v527_v44, %v539_v48  ;;  %642 = vst.msk [vmem:[%s524_s24 + $0x10] sm:$0xff] %vm606_vm2, %v539_v48  ;;  %v519_v43 = vcvt.s32.f32 %v515_v40  ;;  %v516_v44 = vunpack.c.1.s8 %v514_v32 }
 0x22f   : > { %v532_v53 = vpop.xlane.xlu0 %531  ;;  %v536_v54 = vpop.xlane.xlu1 %535 }
 0x230   : > { %v545_v55 = vmul.f32 1.442695, %v541_v51  ;;  %v538_v56 = vmax.f32 %v526_v49, %v532_v53  ;;  %v549_v57 = vmul.f32 1.442695, %v543_v52  ;;  %v540_v58 = vmax.f32 %v528_v50, %v536_v54 }
 0x231   : > { %v520_v47 = vcvt.s32.f32 %v516_v44 }
 0x232   : > { %1256 = vpow2.f32 %v545_v55  ;;  %v542_v59 = vsub.f32 %v526_v49, %v538_v56  ;;  %641 = vst.msk [vmem:[%s524_s24 + $0x8] sm:$0xff] %vm606_vm2, %v538_v56  ;;  %560 = vperm.xlu1 %1255, %v538_v56   ;;  %v544_v60 = vsub.f32 %v528_v50, %v540_v58  ;;  %643 = vst.msk [vmem:[%s524_s24 + $0x18] sm:$0xff] %vm606_vm2, %v540_v58 }
 0x233   : > { %1258 = vpow2.f32 %v549_v57 }
 0x234   : > { %v547_v61 = vmul.f32 1.442695, %v542_v59  ;;  %v551_v62 = vmul.f32 1.442695, %v544_v60 }
 0x236   : > { %1260 = vpow2.f32 %v547_v61  ;;  %565 = vperm.xlu1 %1255, %v539_v48   ;;  %v518_v48 = vunpack.c.3.s8 %v514_v32 }
 0x237   : > { %1262 = vpow2.f32 %v551_v62 }
 0x238   : > { %v522_v50 = vcvt.s32.f32 %v518_v48 }
 0x23a   : > { %570 = vperm.xlu1 %1255, %v540_v58  }
 0x23c   : > { %v1257_v3 = vpop.eup %1256 }
 0x23d   : > { %v1259_v4 = vpop.eup %1258  ;;  %v590_v5 = vmul.f32 %v1257_v3, %v586_v63  ;;  %v1943_v6 = vmul.f32 %v1257_v3, %v612_v0 }
 0x23e   : > { %v592_v8 = vmul.f32 %v1259_v4, %v588_v1  ;;  %v618_v9 = vmul.f32 %v1259_v4, %v614_v2 }
 0x240   : > { %v1261_v13 = vpop.eup %1260 }
 0x241   : > { %v1263_v14 = vpop.eup %1262  ;;  %v591_v15 = vmul.f32 %v1261_v13, %v587_v7  ;;  %v1949_v16 = vmul.f32 %v1261_v13, %v613_v10 }
 0x242   : > { %v593_v17 = vmul.f32 %v1263_v14, %v589_v11  ;;  %v1951_v18 = vmul.f32 %v1263_v14, %v615_v12 }
 0x2ad   : > { %v556_v19 = vpop.permute.xlu0 %555 }
 0x2ae   : > { %v573_v20 = vsub.f32 %v1898_v38, %v556_v19 }
 0x2b0   : > { %v577_v21 = vmul.f32 1.442695, %v573_v20 }
 0x2b1   : > { %v561_v22 = vpop.permute.xlu1 %560 }
 0x2b2   : > { %1264 = vpow2.f32 %v577_v21  ;;  %v574_v23 = vsub.f32 %v1894_v34, %v561_v22 }
 0x2b4   : > { %v579_v24 = vmul.f32 1.442695, %v574_v23 }
 0x2b5   : > { %v566_v25 = vpop.permute.xlu1 %565 }
 0x2b6   : > { %1266 = vpow2.f32 %v579_v24  ;;  %v575_v26 = vsub.f32 %v1900_v39, %v566_v25 }
 0x2b8   : > { %v581_v27 = vmul.f32 1.442695, %v575_v26 }
 0x2b9   : > { %v571_v28 = vpop.permute.xlu1 %570 }
 0x2ba   : > { %1268 = vpow2.f32 %v581_v27  ;;  %v576_v29 = vsub.f32 %v1896_v35, %v571_v28 }
 0x2bc   : > { %v1265_v30 = vpop.eup %1264  ;;  %v583_v31 = vmul.f32 1.442695, %v576_v29 }
 0x2bd   : > { %594 = vadd.xlane.f32.xlu1 %v1265_v30  ;;  %v620_v46 = vmul.f32 %v1265_v30, %v519_v43 }
 0x2be   : > { %1270 = vpow2.f32 %v583_v31 }
 0x2c0   : > { %v1267_v36 = vpop.eup %1266 }
 0x2c1   : > { %596 = vadd.xlane.f32.xlu0 %v1267_v36  ;;  %v621_v49 = vmul.f32 %v1267_v36, %v520_v47 }
 0x2c4   : > { %v1269_v41 = vpop.eup %1268 }
 0x2c5   : > { %598 = vadd.xlane.f32.xlu1 %v1269_v41  ;;  %v622_v42 = vmul.f32 %v1269_v41, %v521_v37 }
 0x2c7   : > { %628 = vadd.xlane.f32.xlu0 %v622_v42 }
 0x2c8   : > { %v1271_v45 = vpop.eup %1270 }
 0x2c9   : > { %600 = vadd.xlane.f32.xlu1 %v1271_v45  ;;  %v623_v51 = vmul.f32 %v1271_v45, %v522_v50 }
 0x2cd   : > { %624 = vadd.xlane.f32.xlu1 %v620_v46 }
 0x2d1   : > { %626 = vadd.xlane.f32.xlu1 %v621_v49 }
 0x2d5   : > { %630 = vadd.xlane.f32.xlu1 %v623_v51 }
 0x34a   : > { %v595_v52 = vpop.xlane.xlu1 %594 }
 0x34b   : > { %v602_v53 = vadd.f32 %v595_v52, %v590_v5 }
 0x34d   : > { %607 = vst.msk [vmem:[%s1934_s28] sm:$0xff] %vm606_vm2, %v602_v53 }
 0x34e   : > { %v597_v54 = vpop.xlane.xlu0 %596 }
 0x34f   : > { %v603_v55 = vadd.f32 %v597_v54, %v591_v15 }
 0x351   : > { %608 = vst.msk [vmem:[%s1934_s28 + $0x8] sm:$0xff] %vm606_vm2, %v603_v55 }
 0x352   : > { %v599_v56 = vpop.xlane.xlu1 %598 }
 0x353   : > { %v604_v57 = vadd.f32 %v599_v56, %v592_v8 }
 0x354   : > { %v629_v58 = vpop.xlane.xlu0 %628 }
 0x355   : > { %609 = vst.msk [vmem:[%s1934_s28 + $0x10] sm:$0xff] %vm606_vm2, %v604_v57  ;;  %v634_v59 = vadd.f32 %v629_v58, %v618_v9 }
 0x356   : > { %v601_v60 = vpop.xlane.xlu1 %600 }
 0x357   : > { %638 = vst.msk [vmem:[%s1938_s25 + $0x10] sm:$0xff] %vm606_vm2, %v634_v59  ;;  %v605_v61 = vadd.f32 %v601_v60, %v593_v17 }
 0x359   : > { %610 = vst.msk [vmem:[%s1934_s28 + $0x18] sm:$0xff] %vm606_vm2, %v605_v61 }
 0x35a   : > { %v625_v62 = vpop.xlane.xlu1 %624 }
 0x35b   : > { %v632_v63 = vadd.f32 %v625_v62, %v1943_v6 }
 0x35d   : > { %636 = vst.msk [vmem:[%s1938_s25] sm:$0xff] %vm606_vm2, %v632_v63 }
 0x35e   : > { %v627_v0 = vpop.xlane.xlu1 %626 }
 0x35f   : > { %v633_v1 = vadd.f32 %v627_v0, %v1949_v16 }
 0x361   : > { %637 = vst.msk [vmem:[%s1938_s25 + $0x8] sm:$0xff] %vm606_vm2, %v633_v1 }
 0x362   : > { %v631_v2 = vpop.xlane.xlu1 %630 }
 0x363   : > { %v635_v3 = vadd.f32 %v631_v2, %v1951_v18 }
 0x365   : > { %639 = vst.msk [vmem:[%s1938_s25 + $0x18] sm:$0xff] %vm606_vm2, %v635_v3 }
 0x366 PF: > { %s2151_s3 = sld [smem:[#allocation16_spill]] }
 0x36c   : > { %p982_p10 = scmp.ne.s32.totalorder %s2151_s3, 1 }
 0x36d   : > { %s983_s12 = sshll.u32 (!%p982_p10), %s1508_s26, 5  ;;  %v687_v4 = vld [vmem:[%s1860_s13 + $0x8] sm:$0xff] (!%p982_p10)  ;;  %v686_v5 = vld [vmem:[%s1860_s13] sm:$0xff] (!%p982_p10)  ;;  %v689_v6 = vld [vmem:[%s1860_s13 + $0x18] sm:$0xff] (!%p982_p10)  ;;  %v1533_v7 = vmov (!%p982_p10), 0  }
 0x36e   : > { %647 = sbr.rel (%p982_p10) target bundleno = 1041 (0x411), region = 56  ;;  %1273 = vset.pattern.permute.xlu1 (!%p982_p10), %v1533_v7  ;;  %1272 = vset.pattern.permute.xlu0 (!%p982_p10), %v1533_v7  ;;  %v688_v8 = vld [vmem:[%s1860_s13 + $0x10] sm:$0xff] (!%p982_p10)  ;;  %s649_s27 = scalar_lea.vmem (!%p982_p10), [#allocation2], %s983_s12  ;;  %vm691_vm3 = vcmp.gt.f32.partialorder (!%p982_p10), %v687_v4, 0.0  ;;  %vm690_vm4 = vcmp.gt.f32.partialorder (!%p982_p10), %v686_v5, 0.0  ;;  %vm693_vm5 = vcmp.gt.f32.partialorder (!%p982_p10), %v689_v6, 0.0 }
 0x36f   : > { %v652_v9 = vld [vmem:[%s649_s27 + $0x10] sm:$0xff] (!%p982_p10)  ;;  %s694_s14 = scalar_lea.vmem (!%p982_p10), [#allocation3], %s983_s12  ;;  %v650_v14 = vld [vmem:[%s649_s27] sm:$0xff] (!%p982_p10)  ;;  %v653_v15 = vld [vmem:[%s649_s27 + $0x18] sm:$0xff] (!%p982_p10)  ;;  %s703_s9 = scalar_lea.vmem (!%p982_p10), [#allocation4], %s983_s12  ;;  %vm692_vm6 = vcmp.gt.f32.partialorder (!%p982_p10), %v688_v8, 0.0 }
 0x370   : > { %v695_v10 = vld [vmem:[%s694_s14] sm:$0xff] (!%p982_p10)  ;;  %v696_v11 = vld [vmem:[%s694_s14 + $0x8] sm:$0xff] (!%p982_p10)  ;;  %v697_v12 = vld [vmem:[%s694_s14 + $0x10] sm:$0xff] (!%p982_p10)  ;;  %666 = vperm.xlu1 (!%p982_p10), %1273, %v652_v9   ;;  %656 = vperm.xlu0 (!%p982_p10), %1272, %v650_v14  }
 0x371   : > { %v698_v13 = vld [vmem:[%s694_s14 + $0x18] sm:$0xff] (!%p982_p10)  ;;  %1274 = vrcp.f32 (!%p982_p10), %v695_v10  ;;  %v651_v16 = vld [vmem:[%s649_s27 + $0x8] sm:$0xff] (!%p982_p10)  ;;  %v704_v19 = vld [vmem:[%s703_s9] sm:$0xff] (!%p982_p10) }
 0x372   : > { %1276 = vrcp.f32 (!%p982_p10), %v696_v11  ;;  %v705_v17 = vld [vmem:[%s703_s9 + $0x8] sm:$0xff] (!%p982_p10)  ;;  %v707_v20 = vld [vmem:[%s703_s9 + $0x18] sm:$0xff] (!%p982_p10)  ;;  %v706_v21 = vld [vmem:[%s703_s9 + $0x10] sm:$0xff] (!%p982_p10)  ;;  %v708_v22 = vsel (!%p982_p10), %vm690_vm4, %v704_v19, 1.0 }
 0x373   : > { %1278 = vrcp.f32 (!%p982_p10), %v697_v12  ;;  %v709_v18 = vsel (!%p982_p10), %vm691_vm3, %v705_v17, 1.0  ;;  %v711_v23 = vsel (!%p982_p10), %vm693_vm5, %v707_v20, 1.0  ;;  %v710_v24 = vsel (!%p982_p10), %vm692_vm6, %v706_v21, 1.0 }
 0x374   : > { %1280 = vrcp.f32 (!%p982_p10), %v698_v13  ;;  %671 = vperm.xlu1 (!%p982_p10), %1273, %v653_v15   ;;  %661 = vperm.xlu0 (!%p982_p10), %1272, %v651_v16  }
 0x375   : > { %1282 = vrcp.f32 %v709_v18 }
 0x376   : > { %1284 = vrcp.f32 %v708_v22 }
 0x377   : > { %1286 = vrcp.f32 %v711_v23 }
 0x378   : > { %1288 = vrcp.f32 %v710_v24 }
 0x37b   : > { %v1275_v25 = vpop.eup %1274 }
 0x37c   : > { %v1277_v26 = vpop.eup %1276 }
 0x37d   : > { %v1279_v27 = vpop.eup %1278 }
 0x37e   : > { %v1281_v28 = vpop.eup %1280 }
 0x37f   : > { %v1283_v29 = vpop.eup %1282 }
 0x380   : > { %v1285_v30 = vpop.eup %1284  ;;  %v717_v31 = vmul.f32 %v1283_v29, %v687_v4 }
 0x381   : > { %v1287_v32 = vpop.eup %1286  ;;  %v716_v33 = vmul.f32 %v1285_v30, %v686_v5 }
 0x382   : > { %v1289_v36 = vpop.eup %1288  ;;  %v721_v37 = vsel %vm691_vm3, %v717_v31, %v1277_v26  ;;  %v719_v40 = vmul.f32 %v1287_v32, %v689_v6 }
 0x383   : > { %731 = vperm.xlu1 %1273, %v721_v37   ;;  %v720_v41 = vsel %vm690_vm4, %v716_v33, %v1275_v25  ;;  %v718_v42 = vmul.f32 %v1289_v36, %v688_v8 }
 0x384   : > { %726 = vperm.xlu0 %1272, %v720_v41   ;;  %v723_v43 = vsel %vm693_vm5, %v719_v40, %v1281_v28 }
 0x385   : > { %v722_v44 = vsel %vm692_vm6, %v718_v42, %v1279_v27 }
 0x387   : > { %741 = vperm.xlu1 %1273, %v723_v43  }
 0x388   : > { %736 = vperm.xlu0 %1272, %v722_v44  }
 0x3ef   : > { %v667_v45 = vpop.permute.xlu1 %666  ;;  %v657_v46 = vpop.permute.xlu0 %656 }
 0x3f0   : > { %v674_v47 = vsub.f32 %v1898_v38, %v657_v46  ;;  %v676_v50 = vsub.f32 %v1900_v39, %v667_v45 }
 0x3f2   : > { %v678_v48 = vmul.f32 1.442695, %v674_v47  ;;  %v682_v56 = vmul.f32 1.442695, %v676_v50 }
 0x3f3   : > { %v672_v49 = vpop.permute.xlu1 %671  ;;  %v662_v52 = vpop.permute.xlu0 %661 }
 0x3f4   : > { %v677_v51 = vsub.f32 %v1896_v35, %v672_v49  ;;  %v675_v53 = vsub.f32 %v1894_v34, %v662_v52  ;;  %1290 = vpow2.f32 %v678_v48 }
 0x3f6   : > { %v684_v54 = vmul.f32 1.442695, %v677_v51  ;;  %v680_v55 = vmul.f32 1.442695, %v675_v53 }
 0x3f8   : > { %1292 = vpow2.f32 %v684_v54 }
 0x3f9   : > { %1294 = vpow2.f32 %v680_v55 }
 0x3fa   : > { %1296 = vpow2.f32 %v682_v56 }
 0x3fe   : > { %v1291_v57 = vpop.eup %1290 }
 0x402   : > { %v732_v58 = vpop.permute.xlu1 %731  ;;  %v1293_v59 = vpop.eup %1292 }
 0x403   : > { %v727_v38 = vpop.permute.xlu0 %726  ;;  %v1295_v60 = vpop.eup %1294 }
 0x404   : > { %v744_v61 = vmul.f32 %v1291_v57, %v727_v38  ;;  %v745_v62 = vmul.f32 %v1295_v60, %v732_v58  ;;  %v1297_v35 = vpop.eup %1296 }
 0x406   : > { %vm748_vm7 = vcmp.gt.f32.partialorder %v744_v61, 0.001  ;;  %v742_v39 = vpop.permute.xlu1 %741  ;;  %vm749_vm8 = vcmp.gt.f32.partialorder %v745_v62, 0.001 }
 0x407   : > { %v752_v34 = vsel %vm748_vm7, %v744_v61, 0.0  ;;  %v747_v63 = vmul.f32 %v1293_v59, %v742_v39  ;;  %v737_v0 = vpop.permute.xlu0 %736  ;;  %v753_v1 = vsel %vm749_vm8, %v745_v62, 0.0 }
 0x408   : > { %v756_v2 = vmax.f32 %v752_v34, 0.0  ;;  %v746_v3 = vmul.f32 %v1297_v35, %v737_v0  ;;  %v757_v4 = vmax.f32 %v753_v1, 0.0 }
 0x409   : > { %vm751_vm9 = vcmp.gt.f32.partialorder %v747_v63, 0.001 }
 0x40a   : > { %v760_v5 = vmin.f32 %v756_v2, 1.0  ;;  %v755_v6 = vsel %vm751_vm9, %v747_v63, 0.0  ;;  %vm750_vm10 = vcmp.gt.f32.partialorder %v746_v3, 0.001  ;;  %v761_v7 = vmin.f32 %v757_v4, 1.0 }
 0x40b   : > { %v759_v8 = vmax.f32 %v755_v6, 0.0  ;;  %v754_v9 = vsel %vm750_vm10, %v746_v3, 0.0 }
 0x40c   : > { %764 = vst [vmem:[%s1903_s21] sm:$0xff] %v760_v5  ;;  %v758_v10 = vmax.f32 %v754_v9, 0.0  ;;  %765 = vst [vmem:[%s1903_s21 + $0x8] sm:$0xff] %v761_v7 }
 0x40d   : > { %v763_v11 = vmin.f32 %v759_v8, 1.0 }
 0x40e   : > { %v762_v12 = vmin.f32 %v758_v10, 1.0 }
 0x40f   : > { %767 = vst [vmem:[%s1903_s21 + $0x18] sm:$0xff] %v763_v11 }
 0x410   : > { %766 = vst [vmem:[%s1903_s21 + $0x10] sm:$0xff] %v762_v12 }
 0x411 PF: > { %s2152_s13 = sld [smem:[#allocation16_spill]]  ;;  %s2153_s23 = sld [smem:[#allocation15_spill]] }
 0x412   : > { %s991_s18 = sshll.u32 %s1508_s26, 3  ;;  %s787_s8 = sshll.u32 %s1903_s21, 4  ;;  %s2004_s8 = int_to_ptr.vmem [resolvable:$true] %s787_s8 }
 0x413   : > { %s2154_s25 = sld [smem:[#allocation26_spill]]  ;;  %s2013_s27 = scalar_lea.sflag [#allocation7], %s342_s4 }
 0x414   : > { %s1358_s14 = scalar_lea.vmem %s2004_s8, 512  ;;  %p2156_p13 = scmp.ne.s32.totalorder %s2138_s6, 0 }
 0x415   : > { %p1359_p9 = scmp.ne.s32.totalorder %s2004_s8, %s1358_s14  ;;  %s1534_s26 = smov [#allocation10]  }
 0x416   : > { %s1362_s21 = sshll.u32 %s1534_s26, 4  ;;  %s1363_s21 = int_to_ptr.vmem [resolvable:$false] %s1362_s21 }
 0x417   : > { %s778_s11 = smul.u32 %s2153_s23, %s2152_s13  ;;  %p1360_p5 = pnand %p1359_p9, %p2156_p13 }
 0x418   : > { %s1364_s9 = scalar_lea.vmem %s1363_s21, 1024  ;;  %p1365_p0 = scmp.lt.s32.totalorder %s2004_s8, %s1363_s21 }
 0x419   : > { %s784_s1 = sadd.s32 %s991_s18, %s778_s11  ;;  %s2155_s3 = smov %s2154_s25 }
 0x41a   : > { %s987_s7 = sshll.u32 %s784_s1, 7  ;;  %p1361_p11 = pneg %p1360_p5 }
 0x41b   : > { %s2009_s12 = scalar_lea.hbm %s2154_s25, %s987_s7  ;;  %p1366_p8 = scmp.lt.s32.totalorder %s1364_s9, %s1358_s14 }
 0x41d   : > { %p1367_p4 = por %p1366_p8, %p1365_p0 }
 0x41f   : > { %p1368_p2 = pnand %p1367_p4, %p1361_p11 }
 0x421   : > { %1371 = shalt.err (!%p1368_p2)
}
 0x422   : > { %s1372_s4 = scalar_lea.hbm %s2009_s12, 512  ;;  %s1376_s11 = scalar_lea.hbm %s2155_s3, 2048 }
 0x423   : > { %p1373_p6 = scmp.ne.s32.totalorder %s2009_s12, %s1372_s4  ;;  %p1377_p12 = scmp.lt.u32.totalorder %s2009_s12, %s2155_s3 }
 0x424   : > { %p1378_p3 = scmp.lt.u32.totalorder %s1376_s11, %s1372_s4  ;;  %p1380_p9 = scmp.lt.u32.totalorder %s1372_s4, %s2009_s12 }
 0x425   : > { %p1374_p1 = pnand %p1373_p6, %p2156_p13 }
 0x426   : > { %p1379_p10 = por %p1378_p3, %p1377_p12 }
 0x427   : > { %p1375_p7 = pneg %p1374_p1 }
 0x428   : > { %p1381_p5 = por %p1380_p9, %p1379_p10 }
 0x42a   : > { %p1382_p11 = pnand %p1381_p5, %p1375_p7 }
 0x42c   : > { %1385 = shalt.err (!%p1382_p11)
}
 0x42d   : > { %s1535_s7 = smov 128   ;;  %s1536_s24 = smov 256  }
 0x42e   : > { %s1537_s28 = smov 8  }
 0x42f   : > { %1102 = dma.vmem_to_hbm [thread:$0]  (%p2156_p13), %s2004_s8, 512, %s2009_s12, %s2013_s27, %s1535_s7, %s1536_s24, %s1537_s28  }
 0x430 PF: > { %p1116_p0 = scmp.ge.s32.totalorder %s1524_s30, 2  ;;  %s802_s25 = sand.u32 1, %s1464_s15  }
 0x431   : > { %p2157_p8 = scmp.ne.s32.totalorder %s2140_s10, 0  ;;  %s803_s14 = scalar_lea.sflag [#allocation7], %s802_s25 }
 0x433   : > { %p1112_p4 = pnand %p1116_p0, %p2157_p8 }
 0x435   : > { %1459 = dma.done.wait (!%p1112_p4), %s803_s14, 512  }
 0x436   : > { %1461 = vsyncadd (!%p1112_p4), %s803_s14, 4294966784  ;;  %s23_s30 = sadd.s32 1, %s1524_s30   ;;  %s2159_s6 = sld [smem:[#allocation14_spill]] }
 0x437   : > { %p2042_p2 = scmp.ge.s32.totalorder %s23_s30, 10   ;;  %s2160_s23 = sld [smem:[#allocation21_spill]] }
 0x438   : > { %s2161_s24 = sld [smem:[#allocation17_spill]]  ;;  %s2162_s25 = sld [smem:[#allocation18_spill]] }
 0x439   : > { %s2163_s27 = sld [smem:[#allocation19_spill]]  ;;  %s2164_s28 = sld [smem:[#allocation20_spill]] }
 0x43a   : > { %s2165_s10 = sld [smem:[#allocation22_spill]]  ;;  %s2166_s15 = smov %s1468_s16 }
 0x43b   : > { %s2168_s16 = smov %s1472_s17  ;;  %s2169_s17 = smov %s1785_s5 }
 0x43c   : > { %s2170_s18 = smov %s1480_s19  ;;  %s2171_s19 = smov %s1484_s20 }
 0x43d   : > { %s2172_s20 = smov %s1770_s0  ;;  %s2173_s21 = smov %s1492_s22 }
 0x43e   : > { %s2174_s22 = smov %s2159_s6  ;;  %s2175_s26 = smov %s1520_s29 }
 0x43f   :  { %22 = sbr.rel (!%p2042_p2) target bundleno = 18 (0x12), region = 121 }
 0x440   : > { %s2176_s29 = smov %s2165_s10 }
 0x446   :  { %808 = vsyncpa [#allocation6], 1 }
 0x447   :  { %810 = vsyncpa [#allocation6 + $0x1], 1 }
 0x448   :  { %811 = vsyncpa [#allocation9], 1 }
 0x449   :  { %813 = vsyncpa [#allocation9 + $0x1], 1 }
 0x44a   :  { %814 = vsyncpa [#allocation7], 1 }
 0x44b   :  { %816 = vsyncpa [#allocation7 + $0x1], 1 }

</bundles_post_ra>
